<compile_context>
chip_gen: v7x
topology: tpu7x:2x2x1
jax: 0.10.0
libtpu: 0.0.40
codegen_flags: <defaults>
</compile_context>

<pallas_src>
import jax
import jax.numpy as jnp
from jax.experimental import pallas as pl
from jax.experimental.pallas import tpu as pltpu

_LANE_CANDIDATES = (2048, 1024, 512, 256, 128)
_SMALL_BYTES = 256 * 1024  # below this, kernel-launch overhead dominates


def _binary_tanh_kernel(x_ref, o_ref):
    # sign(2*tanh(x)) == sign(x): compare+select in the I/O dtype.
    one = jnp.asarray(1, dtype=o_ref.dtype)
    o_ref[...] = jnp.where(x_ref[...] >= 0, one, -one)


def _sign_xla(x):
    one = jnp.asarray(1, dtype=x.dtype)
    return jnp.where(x >= 0, one, -one)


def _chip_tuning():
    """Returns (target_tile_bytes, vmem_limit_bytes_or_None, row_axis_semantics)."""
    try:
        kind = jax.devices()[0].device_kind.lower()
    except Exception:
        kind = ""
    if "v7" in kind:
        # v7x: ~3.2 TB/s HBM -> 8 MiB tiles to amortize the ~0.35us/step overhead.
        # 8 MiB * 2 bufs * (in+out) = 32 MiB, so raise the scoped-VMEM limit
        # explicitly (physical VMEM is 64 MiB/TC). Shard the row grid across the
        # two TensorCores.
        sem = getattr(pltpu, "CORE_PARALLEL", "parallel")
        return 8 * 1024 * 1024, 48 * 1024 * 1024, sem
    if "v6" in kind:
        # v6e: 4 MiB tiles (16 MiB double-buffered) stay inside the 32 MiB default.
        return 4 * 1024 * 1024, None, "parallel"
    # v5e (16 MiB scoped-VMEM default) and anything unknown: 2 MiB tiles, no override.
    return 2 * 1024 * 1024, None, "parallel"


def binary_tanh(x, *, donate=False, force_pallas=False):
    """Elementwise sign(2*tanh(x)) == sign(x) (>=0 -> +1, <0 -> -1) over any shape."""
    orig_shape = x.shape
    dtype = x.dtype
    total = x.size
    if total == 0:
        return x
    itemsize = jnp.dtype(dtype).itemsize

    # Tiny tensors: a fused XLA elementwise is as fast as a kernel launch.
    if total * itemsize < _SMALL_BYTES and not force_pallas:
        return _sign_xla(x)

    # Largest power-of-two lane width dividing the element count -> copy-free reshape.
    lane = next((c for c in _LANE_CANDIDATES if total % c == 0), None)
    if lane is None:
        # Element count not a multiple of 128: padding + slicing would triple HBM
        # traffic around a bandwidth-bound op, so let XLA's fused elementwise
        # (already at HBM roofline for sign()) handle this rare case.
        return _sign_xla(x)

    rows = total // lane
    x2d = jnp.ravel(x).reshape(rows, lane)  # metadata-only for contiguous inputs

    target_tile_bytes, vmem_limit, row_sem = _chip_tuning()

    # Sub-32-bit dtypes pack along sublanes: keep block height >= a full packed tile.
    sublane_floor = max(8, 32 // itemsize)

    br = max(sublane_floor, target_tile_bytes // (lane * itemsize))  # power of two
    # Shrink for small inputs so the grid keeps >= 2 pipelined steps where possible.
    while br > sublane_floor and rows < 2 * br:
        br //= 2
    if rows < br:
        br = rows  # block == full first dim (allowed by the (8,128) rule)

    grid = (pl.cdiv(rows, br),)  # partial last row-block is masked by Pallas

    out2d = pl.pallas_call(
        _binary_tanh_kernel,
        out_shape=jax.ShapeDtypeStruct((rows, lane), dtype),
        grid_spec=pltpu.PrefetchScalarGridSpec(
            num_scalar_prefetch=0,
            grid=grid,
            in_specs=[pl.BlockSpec((br, lane), lambda i: (i, 0))],
            out_specs=pl.BlockSpec((br, lane), lambda i: (i, 0)),
        ),
        compiler_params=pltpu.CompilerParams(
            dimension_semantics=(row_sem,),
            vmem_limit_bytes=vmem_limit,
        ),
        cost_estimate=pl.CostEstimate(
            flops=total, transcendentals=0, bytes_accessed=2 * total * itemsize
        ),
        input_output_aliases=({0: 0} if donate else {}),
    )(x2d)

    return out2d.reshape(orig_shape)


if __name__ == "__main__":
    def ref_fn(v):
        # Reference: sign(2*tanh(v)) with the module's >=0 -> +1 convention.
        return jnp.where(jnp.tanh(v) * 2.0 >= 0.0, 1.0, -1.0).astype(v.dtype)

    # Spec-shaped NCHW activation; force the Pallas path (a tensor this small would
    # otherwise take the fused-XLA early-out).
    x = jax.random.normal(jax.random.PRNGKey(0), (2, 4, 16, 16), dtype=jnp.float32)
    out = binary_tanh(x, force_pallas=True)
    jax.block_until_ready(out)
    assert out.shape == x.shape and out.dtype == x.dtype
    assert bool(jnp.all(out == ref_fn(x)))

    # Larger activation tensor: exercises the multi-step pipelined grid.
    x_big = jax.random.normal(jax.random.PRNGKey(1), (8, 64, 32, 32), dtype=jnp.float32)
    out_big = binary_tanh(x_big)
    jax.block_until_ready(out_big)
    assert bool(jnp.all(out_big == ref_fn(x_big)))

    # Ragged element count (945, not a multiple of 128): copy-free fallback path.
    x_odd = jax.random.normal(jax.random.PRNGKey(2), (3, 5, 7, 9), dtype=jnp.float32)
    out_odd = binary_tanh(x_odd)
    jax.block_until_ready(out_odd)
    assert out_odd.shape == x_odd.shape and out_odd.dtype == x_odd.dtype
    assert bool(jnp.all(out_odd == ref_fn(x_odd)))

    # bf16 path (sublane-packed dtype, dtype-aware block-height floor).
    x_bf = jax.random.normal(jax.random.PRNGKey(3), (4, 32, 32, 32), dtype=jnp.bfloat16)
    out_bf = binary_tanh(x_bf)
    jax.block_until_ready(out_bf)
    assert out_bf.dtype == jnp.bfloat16
    assert bool(jnp.all(out_bf == ref_fn(x_bf)))

    print("KERNEL_OK")
</pallas_src>

<mosaic_0001>
module attributes {stable_mosaic.version = 11 : i64} {
  func.func @_binary_tanh_kernel(%arg0: i32, %arg1: memref<1x2048xf32, #tpu.memory_space<vmem>>, %arg2: memref<1x2048xf32, #tpu.memory_space<vmem>>) attributes {dimension_semantics = [#tpu.dimension_semantics<parallel>], iteration_bounds = array<i64: 1>, scalar_prefetch = 0 : i64, scratch_operands = 0 : i64, tpu.core_type = #tpu.core_type<tc>, window_params = [{transform_indices = @transform_0, window_bounds = array<i64: 1, 2048>}, {transform_indices = @transform_1, window_bounds = array<i64: 1, 2048>}]} {
    %c0 = arith.constant 0 : index
    %c0_0 = arith.constant 0 : index
    %0 = vector.load %arg1[%c0, %c0_0] : memref<1x2048xf32, #tpu.memory_space<vmem>>, vector<1x2048xf32>
    %cst = arith.constant 0.000000e+00 : f32
    %1 = vector.broadcast %cst : f32 to vector<1x2048xf32>
    %2 = arith.cmpf oge, %0, %1 : vector<1x2048xf32>
    %cst_1 = arith.constant 0.000000e+00 : f32
    %cst_2 = arith.constant 1.000000e+00 : f32
    %3 = arith.subf %cst_1, %cst_2 : f32
    %cst_3 = arith.constant 1.000000e+00 : f32
    %4 = vector.broadcast %cst_3 : f32 to vector<1x2048xf32>
    %5 = vector.broadcast %3 : f32 to vector<1x2048xf32>
    %6 = arith.select %2, %4, %5 : vector<1x2048xi1>, vector<1x2048xf32>
    %c0_4 = arith.constant 0 : index
    %c0_5 = arith.constant 0 : index
    %7 = vector.load %arg2[%c0_4, %c0_5] : memref<1x2048xf32, #tpu.memory_space<vmem>>, vector<1x2048xf32>
    tpu.vector_store %arg2[%c0_4, %c0_5], %6 {strides = array<i32>} : memref<1x2048xf32, #tpu.memory_space<vmem>>, vector<1x2048xf32>,
    return
  }
  func.func @transform_0(%arg0: i32) -> (i32, i32) {
    %c0_i32 = arith.constant 0 : i32
    %c0_i32_0 = arith.constant 0 : i32
    return %arg0, %c0_i32 : i32, i32
  }
  func.func @transform_1(%arg0: i32) -> (i32, i32) {
    %c0_i32 = arith.constant 0 : i32
    %c0_i32_0 = arith.constant 0 : i32
    return %arg0, %c0_i32 : i32, i32
  }
}

</mosaic_0001>

<bundles_post_ra>
// kernel: tpu_custom_call.1
= control target key start
LH: loop header
LB: loop body
LE: loop exit
PB: predicated region body
PF: predicated region fallthrough
CT: control target
= control target key end

     0   :  { %6 = vsyncpa [#allocation3], 0  ;;  %s132_s0 = inlined_call_operand.hbm [shape: f32[1,2048], index: 0, kind: input, shape index: {}]   ;;  %s133_s1 = inlined_call_operand.hbm [shape: f32[1,2048], index: 1, kind: output, shape index: {}]  }
   0x1   :  { %7 = vsyncpa [#allocation4], 0  ;;  %s95_s6 = smov [#allocation2]   ;;  %s47_s10 = scalar_lea.hbm %s132_s0, 256 }
   0x2   :  { %s14_s7 = sshll.u32 %s95_s6, 4  ;;  %p48_p0 = scmp.ne.s32.totalorder %s132_s0, %s47_s10  ;;  %s15_s7 = int_to_ptr.vmem [resolvable:$true] %s14_s7 }
   0x3   :  { %p51_p1 = scmp.lt.u32.totalorder %s47_s10, %s132_s0 }
   0x5   :  { %p53_p2 = pnand %p51_p1, %p48_p0 }
   0x7   :  { %56 = shalt.err (!%p53_p2)
}
   0x8   :  { %s57_s15 = scalar_lea.vmem %s15_s7, 256  ;;  %p62_p4 = scmp.lt.s32.totalorder %s15_s7, %s15_s7 }
   0x9   :  { %p58_p3 = scmp.ne.s32.totalorder %s15_s7, %s57_s15  ;;  %p63_p5 = scmp.lt.s32.totalorder %s57_s15, %s57_s15 }
   0xb   :  { %p64_p6 = por %p63_p5, %p62_p4 }
   0xd   :  { %p65_p7 = pnand %p64_p6, %p58_p3 }
   0xf   :  { %68 = shalt.err (!%p65_p7)
}
  0x10   :  { %17 = dma.hbm_to_vmem [thread:$0]  %s132_s0, 256, %s15_s7, [#allocation3]  }
  0x11   :  { %91 = dma.done.wait [#allocation3], 256  }
  0x12   :  { %92 = vsyncadd [#allocation3], 4294967040  ;;  %s96_s18 = smov [#allocation5]   ;;  %v21_v0 = vld [vmem:[#allocation2] sm:$0xff]  ;;  %v22_v1 = vld [vmem:[#allocation2 + $0x8] sm:$0xff]  ;;  %v97_v2 = vmov -1.0  }
  0x13   :  { %s35_s19 = sshll.u32 %s96_s18, 4  ;;  %vm23_vm0 = vcmp.ge.f32.partialorder %v21_v0, 0.0  ;;  %vm24_vm1 = vcmp.ge.f32.partialorder %v22_v1, 0.0  ;;  %s36_s19 = int_to_ptr.vmem [resolvable:$true] %s35_s19 }
  0x14   :  { %v25_v3 = vsel %vm23_vm0, 1.0, %v97_v2  ;;  %v26_v4 = vsel %vm24_vm1, 1.0, %v97_v2  ;;  %s69_s20 = scalar_lea.vmem %s36_s19, 256  ;;  %p74_p9 = scmp.lt.s32.totalorder %s36_s19, %s36_s19 }
  0x15   :  { %27 = vst [vmem:[#allocation5] sm:$0xff] %v25_v3  ;;  %28 = vst [vmem:[#allocation5 + $0x8] sm:$0xff] %v26_v4  ;;  %p70_p8 = scmp.ne.s32.totalorder %s36_s19, %s69_s20  ;;  %p75_p10 = scmp.lt.s32.totalorder %s69_s20, %s69_s20 }
  0x17   :  { %p76_p11 = por %p75_p10, %p74_p9 }
  0x19   :  { %p77_p12 = pnand %p76_p11, %p70_p8 }
  0x1b   :  { %80 = shalt.err (!%p77_p12)
}
  0x1c   :  { %s81_s22 = scalar_lea.hbm %s133_s1, 256 }
  0x1d   :  { %p82_p13 = scmp.ne.s32.totalorder %s133_s1, %s81_s22  ;;  %p85_p0 = scmp.lt.u32.totalorder %s81_s22, %s133_s1 }
  0x1f   :  { %p87_p1 = pnand %p85_p0, %p82_p13 }
  0x21   :  { %90 = shalt.err (!%p87_p1)
}
  0x22   :  { %38 = dma.vmem_to_hbm [thread:$0]  %s36_s19, 256, %s133_s1, [#allocation4]  }
  0x23   :  { %93 = dma.done.wait [#allocation4], 256  }
  0x24   :  { %94 = vsyncadd [#allocation4], 4294967040 }
  0x25   :  { %42 = vsyncpa [#allocation3], 1 }
  0x26   :  { %43 = vsyncpa [#allocation4], 1 }

</bundles_post_ra>
